<compile_context>
chip_gen: v5e
topology: v5e:2x2
jax: 0.10.0
libtpu: 0.0.40
codegen_flags: <defaults>
</compile_context>

<pallas_src>
import functools

import jax
import jax.numpy as jnp
from jax.experimental import pallas as pl
from jax.experimental.pallas import tpu as pltpu

_LANE = 128          # lane width -> last dim of every VMEM tile
_SUBLANE_PACK = 16   # bf16 packs 2 rows/sublane -> keep batch tiles 16-aligned
_MAX_TILE_B = 512    # 512-1024 amortizes the ~0.35 us per-grid-step overhead


def _round_up(n, m):
    return (n + m - 1) // m * m


def _cdiv(a, b):
    return -(-a // b)


def _batch_tiling(batch):
    """(tile_b, padded_batch): minimize pad waste; grid >= 2 when possible."""
    n_tiles = max(1, _cdiv(batch, _MAX_TILE_B))
    if batch >= 2 * _SUBLANE_PACK:
        n_tiles = max(n_tiles, 2)          # keep both v7x TensorCores busy
    tb = _round_up(_cdiv(batch, n_tiles), _SUBLANE_PACK)
    return tb, _round_up(batch, tb)


def _compiler_params(semantics, vmem_need_bytes):
    limit = None
    if vmem_need_bytes > (24 << 20):
        # TODO(synk): on v7x (64 MiB physical VMEM) K-tile W1/W2 over Hp with
        # an extra "arbitrary" grid axis + f32 accumulator instead of keeping
        # both weights fully resident once this approaches ~48 MiB.
        limit = int(min(2 * vmem_need_bytes, 96 << 20))
    return pltpu.CompilerParams(dimension_semantics=semantics,
                                vmem_limit_bytes=limit)


# --------------------------------------------------------------------------
# Kernels
# --------------------------------------------------------------------------
def _node_df_kernel(t_ref, x_ref, w1_ref, b1_ref, wt_ref, w2_ref, b2_ref, o_ref):
    """dx = tanh(x @ W1 + b1 + t*wt) @ W2 + b2 for one batch tile (bf16 out)."""
    t = t_ref[0]                                           # scalar time (SMEM)
    bias = b1_ref[...] + t * wt_ref[...]                   # (1, Hp) f32
    h = jnp.dot(x_ref[...], w1_ref[...],
                preferred_element_type=jnp.float32) + bias  # (TB, Hp) f32 acc
    h = jnp.tanh(h)                                         # EUP, f32
    y = jnp.dot(h.astype(jnp.bfloat16), w2_ref[...],
                preferred_element_type=jnp.float32) + b2_ref[...]
    o_ref[...] = y.astype(o_ref.dtype)                      # bf16 lane-dense store


def _node_rk4_kernel(sched_ref, x0_ref, w1_ref, b1_ref, wt_ref, w2_ref, b2_ref,
                     o_ref, x_sc):
    """One RK4 step per grid point along axis 1; state carried in VMEM scratch."""
    step = pl.program_id(1)
    t0 = sched_ref[0]
    dt = sched_ref[1]

    @pl.when(step == 0)
    def _():
        x_sc[...] = x0_ref[...].astype(jnp.float32)

    def df(t, x_f32):
        bias = b1_ref[...] + t * wt_ref[...]
        h = jnp.dot(x_f32.astype(jnp.bfloat16), w1_ref[...],
                    preferred_element_type=jnp.float32) + bias
        h = jnp.tanh(h)
        return jnp.dot(h.astype(jnp.bfloat16), w2_ref[...],
                       preferred_element_type=jnp.float32) + b2_ref[...]

    t = t0 + dt * step.astype(jnp.float32)
    x = x_sc[...]
    k1 = df(t, x)
    k2 = df(t + 0.5 * dt, x + (0.5 * dt) * k1)
    k3 = df(t + 0.5 * dt, x + (0.5 * dt) * k2)
    k4 = df(t + dt, x + dt * k3)
    x_sc[...] = x + (dt / 6.0) * (k1 + 2.0 * k2 + 2.0 * k3 + k4)

    @pl.when(step == pl.num_programs(1) - 1)
    def _():
        o_ref[...] = x_sc[...].astype(o_ref.dtype)


# --------------------------------------------------------------------------
# pallas_call wrappers
# --------------------------------------------------------------------------
@functools.partial(jax.jit, static_argnames=("tile_b",))
def _df_padded_call(t_arr, xp, w1p, b1p, wtp, w2p, b2p, *, tile_b):
    Bp, Dp = xp.shape
    Hp = w1p.shape[1]
    weight_bytes = 2 * Dp * Hp * 2 + (2 * Hp + Dp) * 4
    cost = pl.CostEstimate(flops=4 * Bp * Dp * Hp,
                           transcendentals=Bp * Hp,
                           bytes_accessed=2 * Bp * Dp * 2 + weight_bytes)
    vmem_need = weight_bytes + 4 * tile_b * Dp * 2   # double-buffered in+out tiles
    return pl.pallas_call(
        _node_df_kernel,
        out_shape=jax.ShapeDtypeStruct((Bp, Dp), jnp.bfloat16),
        grid=(Bp // tile_b,),
        in_specs=[
            pl.BlockSpec(memory_space=pltpu.MemorySpace.SMEM),   # t, (1,) scalar
            pl.BlockSpec((tile_b, Dp), lambda i: (i, 0)),        # x: batch-tiled
            pl.BlockSpec((Dp, Hp), lambda i: (0, 0)),            # W1: VMEM-resident
            pl.BlockSpec((1, Hp), lambda i: (0, 0)),             # b1: resident
            pl.BlockSpec((1, Hp), lambda i: (0, 0)),             # wt: resident
            pl.BlockSpec((Hp, Dp), lambda i: (0, 0)),            # W2: VMEM-resident
            pl.BlockSpec((1, Dp), lambda i: (0, 0)),             # b2: resident
        ],
        out_specs=pl.BlockSpec((tile_b, Dp), lambda i: (i, 0)),  # lane-dense bf16
        compiler_params=_compiler_params(("parallel",), vmem_need),
        cost_estimate=cost,
    )(t_arr, xp, w1p, b1p, wtp, w2p, b2p)


@functools.partial(jax.jit, static_argnames=("tile_b", "n_steps"))
def _rk4_padded_call(sched, xp0, w1p, b1p, wtp, w2p, b2p, *, tile_b, n_steps):
    Bp, Dp = xp0.shape
    Hp = w1p.shape[1]
    n_evals = 4 * n_steps
    weight_bytes = 2 * Dp * Hp * 2 + (2 * Hp + Dp) * 4
    cost = pl.CostEstimate(flops=n_evals * 4 * Bp * Dp * Hp,
                           transcendentals=n_evals * Bp * Hp,
                           bytes_accessed=Bp * Dp * (2 + 4) + weight_bytes)
    vmem_need = weight_bytes + 2 * tile_b * Dp * (2 + 4) + tile_b * Dp * 4
    return pl.pallas_call(
        _node_rk4_kernel,
        out_shape=jax.ShapeDtypeStruct((Bp, Dp), jnp.float32),
        grid=(Bp // tile_b, n_steps),
        in_specs=[
            pl.BlockSpec(memory_space=pltpu.MemorySpace.SMEM),    # [t0, dt]
            pl.BlockSpec((tile_b, Dp), lambda i, s: (i, 0)),      # x0 tile
            pl.BlockSpec((Dp, Hp), lambda i, s: (0, 0)),          # W1 resident
            pl.BlockSpec((1, Hp), lambda i, s: (0, 0)),
            pl.BlockSpec((1, Hp), lambda i, s: (0, 0)),
            pl.BlockSpec((Hp, Dp), lambda i, s: (0, 0)),          # W2 resident
            pl.BlockSpec((1, Dp), lambda i, s: (0, 0)),
        ],
        out_specs=pl.BlockSpec((tile_b, Dp), lambda i, s: (i, 0)),  # written at last step
        scratch_shapes=[pltpu.VMEM((tile_b, Dp), jnp.float32)],     # carried state
        compiler_params=_compiler_params(("parallel", "arbitrary"), vmem_need),
        cost_estimate=cost,
    )(sched, xp0, w1p, b1p, wtp, w2p, b2p)


# --------------------------------------------------------------------------
# Vector field + NODE module
# --------------------------------------------------------------------------
class NodeMLPField:
    """tanh-MLP vector field; weights pre-padded lane-dense, bf16 MXU inputs."""

    def __init__(self, dim, hidden, key):
        k1, k2, k3 = jax.random.split(key, 3)
        w1 = jax.random.normal(k1, (dim, hidden), jnp.float32) / jnp.sqrt(dim)
        b1 = jnp.zeros((1, hidden), jnp.float32)
        wt = jax.random.normal(k2, (1, hidden), jnp.float32) * 0.1
        w2 = jax.random.normal(k3, (hidden, dim), jnp.float32) / jnp.sqrt(hidden)
        b2 = jnp.zeros((1, dim), jnp.float32)
        self.dim, self.hidden = dim, hidden
        self.params = (w1, b1, wt, w2, b2)

        # Pad feature dims to 128 lanes once at init (zero padding is exact:
        # padded K columns hit zero weight rows; padded hidden columns give
        # tanh(0)=0 and hit zero W2 rows).  Matmul weights stored bf16.
        Dp, Hp = _round_up(dim, _LANE), _round_up(hidden, _LANE)
        self.Dp, self.Hp = Dp, Hp
        self.w1p = jnp.zeros((Dp, Hp), jnp.bfloat16).at[:dim, :hidden].set(
            w1.astype(jnp.bfloat16))
        self.b1p = jnp.zeros((1, Hp), jnp.float32).at[:, :hidden].set(b1)
        self.wtp = jnp.zeros((1, Hp), jnp.float32).at[:, :hidden].set(wt)
        self.w2p = jnp.zeros((Hp, Dp), jnp.bfloat16).at[:hidden, :dim].set(
            w2.astype(jnp.bfloat16))
        self.b2p = jnp.zeros((1, Dp), jnp.float32).at[:, :dim].set(b2)

    def _padded_weights(self):
        return (self.w1p, self.b1p, self.wtp, self.w2p, self.b2p)

    # -- padded-state helpers: pad/cast ONCE per solve, not once per nfe ----
    def pad_state(self, x):
        B, D = x.shape
        assert D == self.dim
        tb, Bp = _batch_tiling(B)
        return (jnp.zeros((Bp, self.Dp), jnp.bfloat16)
                .at[:B, :D].set(x.astype(jnp.bfloat16)))

    def unpad_state(self, xp, batch):
        return xp[:batch, :self.dim].astype(jnp.float32)

    # -- df: the module-level vector field -----------------------------------
    def df(self, t, x):
        t_arr = jnp.asarray(t, jnp.float32).reshape(1)
        if x.ndim == 2 and x.dtype == jnp.bfloat16 and x.shape[1] == self.Dp:
            # Hot path: x is a persistent lane-padded bf16 solver state ->
            # no wrapper pad/cast pass, bf16 in / bf16 out.
            Bp = x.shape[0]
            tb, Bp2 = _batch_tiling(Bp)
            if Bp2 != Bp:
                raise ValueError("padded state must come from pad_state()")
            return _df_padded_call(t_arr, x, *self._padded_weights(), tile_b=tb)
        # Compatibility path (PyTorch semantics: f32 in -> f32 out).  Pays one
        # pad+cast pass per call; prefer pad_state() + hot path or odeint_rk4.
        B, _ = x.shape
        tb, _ = _batch_tiling(B)
        xp = self.pad_state(x)
        dxp = _df_padded_call(t_arr, xp, *self._padded_weights(), tile_b=tb)
        return self.unpad_state(dxp, B)

    __call__ = df

    # -- fused fixed-step RK4 solve: ONE pallas_call for the whole solve -----
    def odeint_rk4(self, x, t0, dt, n_steps):
        B, _ = x.shape
        tb, _ = _batch_tiling(B)
        xp = self.pad_state(x)
        sched = jnp.array([t0, dt], jnp.float32)
        yp = _rk4_padded_call(sched, xp, *self._padded_weights(),
                              tile_b=tb, n_steps=int(n_steps))
        return yp[:B, :self.dim]


class NODE:
    """JAX/Pallas port of the PyTorch NODE wrapper: forward(t, x) = df(t, x)."""

    def __init__(self, df=None, **kwargs):
        self.__dict__.update(kwargs)
        self.df = df
        self.nfe = 0          # TODO(synk): nfe is host-side bookkeeping, as in PyTorch

    def forward(self, t, x):
        self.nfe += 1
        return self.df(t, x)

    __call__ = forward


# --------------------------------------------------------------------------
# Pure-JAX references (same bf16-input / f32-accumulation math as the kernels)
# --------------------------------------------------------------------------
def _reference_df(t, x, params):
    w1, b1, wt, w2, b2 = params
    t = jnp.asarray(t, jnp.float32)
    bias = b1 + t * wt
    h = jnp.tanh(jnp.dot(x.astype(jnp.bfloat16), w1.astype(jnp.bfloat16),
                         preferred_element_type=jnp.float32) + bias)
    return jnp.dot(h.astype(jnp.bfloat16), w2.astype(jnp.bfloat16),
                   preferred_element_type=jnp.float32) + b2


def _reference_rk4(x, t0, dt, n_steps, params):
    y = x.astype(jnp.float32)
    t0 = jnp.float32(t0)
    dt = jnp.float32(dt)
    for s in range(n_steps):
        t = t0 + dt * s
        k1 = _reference_df(t, y, params)
        k2 = _reference_df(t + 0.5 * dt, y + (0.5 * dt) * k1, params)
        k3 = _reference_df(t + 0.5 * dt, y + (0.5 * dt) * k2, params)
        k4 = _reference_df(t + dt, y + dt * k3, params)
        y = y + (dt / 6.0) * (k1 + 2.0 * k2 + 2.0 * k3 + k4)
    return y


if __name__ == "__main__":
    key = jax.random.PRNGKey(0)
    kx, kp = jax.random.split(key)

    batch, dim, hidden = 8, 32, 64
    x = jax.random.normal(kx, (batch, dim), jnp.float32)
    t = jnp.float32(0.5)

    field = NodeMLPField(dim, hidden, kp)
    node = NODE(df=field)

    # 1) PyTorch-style forward: f32 in -> f32 out, nfe counted.
    out = jax.block_until_ready(node(t, x))
    ref = _reference_df(t, x, field.params)
    assert out.shape == (batch, dim) and out.dtype == jnp.float32
    assert node.nfe == 1
    assert jnp.allclose(out, ref, atol=2e-2, rtol=2e-2), float(jnp.max(jnp.abs(out - ref)))

    # 2) Hot-path forward on a persistent padded bf16 state (no per-call pad).
    xp = field.pad_state(x)
    dxp = jax.block_until_ready(node(t, xp))
    assert dxp.dtype == jnp.bfloat16 and dxp.shape == xp.shape
    assert node.nfe == 2
    dx = field.unpad_state(dxp, batch)
    assert jnp.allclose(dx, ref, atol=2e-2, rtol=2e-2), float(jnp.max(jnp.abs(dx - ref)))

    # 3) Fused fixed-step RK4 solve: all 4*n_steps df evaluations in a single
    #    pallas_call (weights DMA'd once; state stays in VMEM across steps).
    n_steps = 4
    y = jax.block_until_ready(field.odeint_rk4(x, t0=0.0, dt=0.1, n_steps=n_steps))
    y_ref = _reference_rk4(x, 0.0, 0.1, n_steps, field.params)
    assert y.shape == (batch, dim) and y.dtype == jnp.float32
    assert jnp.allclose(y, y_ref, atol=2e-2, rtol=2e-2), float(jnp.max(jnp.abs(y - y_ref)))

    print("KERNEL_OK")
</pallas_src>

<mosaic_0001>
module attributes {stable_mosaic.version = 11 : i64} {
  func.func @_node_df_kernel(%arg0: i32, %arg1: memref<1xf32, #tpu.memory_space<smem>>, %arg2: memref<16x128xbf16, #tpu.memory_space<vmem>>, %arg3: memref<128x128xbf16, #tpu.memory_space<vmem>>, %arg4: memref<1x128xf32, #tpu.memory_space<vmem>>, %arg5: memref<1x128xf32, #tpu.memory_space<vmem>>, %arg6: memref<128x128xbf16, #tpu.memory_space<vmem>>, %arg7: memref<1x128xf32, #tpu.memory_space<vmem>>, %arg8: memref<16x128xbf16, #tpu.memory_space<vmem>>) attributes {dimension_semantics = [#tpu.dimension_semantics<parallel>], iteration_bounds = array<i64: 1>, scalar_prefetch = 0 : i64, scratch_operands = 0 : i64, tpu.core_type = #tpu.core_type<tc>, window_params = [{transform_indices = @transform_0, window_bounds = array<i64: 1>}, {transform_indices = @transform_1, window_bounds = array<i64: 16, 128>}, {pipeline_mode = #tpu.pipeline_mode<synchronous>, transform_indices = @transform_2, window_bounds = array<i64: 128, 128>}, {pipeline_mode = #tpu.pipeline_mode<synchronous>, transform_indices = @transform_3, window_bounds = array<i64: 1, 128>}, {pipeline_mode = #tpu.pipeline_mode<synchronous>, transform_indices = @transform_4, window_bounds = array<i64: 1, 128>}, {pipeline_mode = #tpu.pipeline_mode<synchronous>, transform_indices = @transform_5, window_bounds = array<i64: 128, 128>}, {pipeline_mode = #tpu.pipeline_mode<synchronous>, transform_indices = @transform_6, window_bounds = array<i64: 1, 128>}, {transform_indices = @transform_7, window_bounds = array<i64: 16, 128>}]} {
    %c0 = arith.constant 0 : index
    %0 = memref.load %arg1[%c0] : memref<1xf32, #tpu.memory_space<smem>>
    %c0_0 = arith.constant 0 : index
    %c0_1 = arith.constant 0 : index
    %1 = vector.load %arg4[%c0_0, %c0_1] : memref<1x128xf32, #tpu.memory_space<vmem>>, vector<1x128xf32>
    %c0_2 = arith.constant 0 : index
    %c0_3 = arith.constant 0 : index
    %2 = vector.load %arg5[%c0_2, %c0_3] : memref<1x128xf32, #tpu.memory_space<vmem>>, vector<1x128xf32>
    %3 = vector.broadcast %0 : f32 to vector<1x128xf32>
    %4 = arith.mulf %3, %2 : vector<1x128xf32>
    %5 = arith.addf %1, %4 : vector<1x128xf32>
    %c0_4 = arith.constant 0 : index
    %c0_5 = arith.constant 0 : index
    %6 = vector.load %arg2[%c0_4, %c0_5] : memref<16x128xbf16, #tpu.memory_space<vmem>>, vector<16x128xbf16>
    %c0_6 = arith.constant 0 : index
    %c0_7 = arith.constant 0 : index
    %7 = vector.load %arg3[%c0_6, %c0_7] : memref<128x128xbf16, #tpu.memory_space<vmem>>, vector<128x128xbf16>
    %cst = arith.constant dense<0.000000e+00> : vector<16x128xf32>
    %8 = tpu.matmul %6, %7, %cst {dimension_numbers = #tpu.dot_dimension_numbers<[1], [0], [0], [1], [0, 0, 1, 1], [], []>} : vector<16x128xbf16>, vector<128x128xbf16>, vector<16x128xf32> -> vector<16x128xf32>
    %9 = vector.broadcast %5 : vector<1x128xf32> to vector<16x128xf32>
    %10 = arith.addf %8, %9 : vector<16x128xf32>
    %11 = math.tanh %10 : vector<16x128xf32>
    %12 = arith.truncf %11 : vector<16x128xf32> to vector<16x128xbf16>
    %c0_8 = arith.constant 0 : index
    %c0_9 = arith.constant 0 : index
    %13 = vector.load %arg6[%c0_8, %c0_9] : memref<128x128xbf16, #tpu.memory_space<vmem>>, vector<128x128xbf16>
    %cst_10 = arith.constant dense<0.000000e+00> : vector<16x128xf32>
    %14 = tpu.matmul %12, %13, %cst_10 {dimension_numbers = #tpu.dot_dimension_numbers<[1], [0], [0], [1], [0, 0, 1, 1], [], []>} : vector<16x128xbf16>, vector<128x128xbf16>, vector<16x128xf32> -> vector<16x128xf32>
    %c0_11 = arith.constant 0 : index
    %c0_12 = arith.constant 0 : index
    %15 = vector.load %arg7[%c0_11, %c0_12] : memref<1x128xf32, #tpu.memory_space<vmem>>, vector<1x128xf32>
    %16 = vector.broadcast %15 : vector<1x128xf32> to vector<16x128xf32>
    %17 = arith.addf %14, %16 : vector<16x128xf32>
    %18 = arith.truncf %17 : vector<16x128xf32> to vector<16x128xbf16>
    %c0_13 = arith.constant 0 : index
    %c0_14 = arith.constant 0 : index
    %19 = vector.load %arg8[%c0_13, %c0_14] : memref<16x128xbf16, #tpu.memory_space<vmem>>, vector<16x128xbf16>
    tpu.vector_store %arg8[%c0_13, %c0_14], %18 {strides = array<i32>} : memref<16x128xbf16, #tpu.memory_space<vmem>>, vector<16x128xbf16>,
    return
  }
  func.func @transform_0(%arg0: i32) -> i32 {
    %c0_i32 = arith.constant 0 : i32
    %c0_i32_0 = arith.constant 0 : i32
    return %c0_i32 : i32
  }
  func.func @transform_1(%arg0: i32) -> (i32, i32) {
    %c0_i32 = arith.constant 0 : i32
    %c0_i32_0 = arith.constant 0 : i32
    return %arg0, %c0_i32 : i32, i32
  }
  func.func @transform_2(%arg0: i32) -> (i32, i32) {
    %c0_i32 = arith.constant 0 : i32
    %c0_i32_0 = arith.constant 0 : i32
    %c0_i32_1 = arith.constant 0 : i32
    return %c0_i32, %c0_i32_0 : i32, i32
  }
  func.func @transform_3(%arg0: i32) -> (i32, i32) {
    %c0_i32 = arith.constant 0 : i32
    %c0_i32_0 = arith.constant 0 : i32
    %c0_i32_1 = arith.constant 0 : i32
    return %c0_i32, %c0_i32_0 : i32, i32
  }
  func.func @transform_4(%arg0: i32) -> (i32, i32) {
    %c0_i32 = arith.constant 0 : i32
    %c0_i32_0 = arith.constant 0 : i32
    %c0_i32_1 = arith.constant 0 : i32
    return %c0_i32, %c0_i32_0 : i32, i32
  }
  func.func @transform_5(%arg0: i32) -> (i32, i32) {
    %c0_i32 = arith.constant 0 : i32
    %c0_i32_0 = arith.constant 0 : i32
    %c0_i32_1 = arith.constant 0 : i32
    return %c0_i32, %c0_i32_0 : i32, i32
  }
  func.func @transform_6(%arg0: i32) -> (i32, i32) {
    %c0_i32 = arith.constant 0 : i32
    %c0_i32_0 = arith.constant 0 : i32
    %c0_i32_1 = arith.constant 0 : i32
    return %c0_i32, %c0_i32_0 : i32, i32
  }
  func.func @transform_7(%arg0: i32) -> (i32, i32) {
    %c0_i32 = arith.constant 0 : i32
    %c0_i32_0 = arith.constant 0 : i32
    return %arg0, %c0_i32 : i32, i32
  }
}

</mosaic_0001>

<bundles_post_ra>
// kernel: _df_padded_call.1
= control target key start
LH: loop header
LB: loop body
LE: loop exit
PB: predicated region body
PF: predicated region fallthrough
CT: control target
= control target key end

     0   :  { %13 = vsyncpa [#allocation4], 0  ;;  %s564_s0 = inlined_call_operand.<no memory space> [shape: f32[1], index: 0, kind: input, shape index: {}]   ;;  %s565_s1 = inlined_call_operand.hbm [shape: bf16[16,128], index: 1, kind: input, shape index: {}]   ;;  %s566_s2 = inlined_call_operand.hbm [shape: bf16[128,128], index: 2, kind: input, shape index: {}]   ;;  %s567_s3 = inlined_call_operand.vmem [shape: f32[1,128], index: 3, kind: input, shape index: {}]   ;;  %s568_s4 = inlined_call_operand.vmem [shape: f32[1,128], index: 4, kind: input, shape index: {}]   ;;  %s569_s5 = inlined_call_operand.hbm [shape: bf16[128,128], index: 5, kind: input, shape index: {}]   ;;  %s570_s6 = inlined_call_operand.vmem [shape: f32[1,128], index: 6, kind: input, shape index: {}]   ;;  %s571_s7 = inlined_call_operand.hbm [shape: bf16[16,128], index: 7, kind: output, shape index: {}]  }
   0x1   :  { %14 = vsyncpa [#allocation7], 0 }
   0x2   :  { %15 = vsyncpa [#allocation5], 0  ;;  %s35_s26 = sshll.u32 %s566_s2, 4  ;;  %s482_s27 = smov [#allocation6]   ;;  %s36_s26 = int_to_ptr.hbm [resolvable:$true] %s35_s26 }
   0x3   :  { %s37_s28 = sshll.u32 %s482_s27, 4  ;;  %s22_s8 = sshll.u32 %s565_s1, 4  ;;  %s38_s28 = int_to_ptr.vmem [resolvable:$true] %s37_s28  ;;  %s23_s8 = int_to_ptr.hbm [resolvable:$true] %s22_s8 }
   0x4   :  { %s483_s9 = smov 64   ;;  %s484_s10 = smov 4  }
   0x5   :  { %43 = dma.hbm_to_vmem [thread:$0]  %s36_s26, 1024, %s38_s28, [#allocation7], %s483_s9, %s483_s9, %s484_s10  }
   0x6   :  { %s485_s11 = smov [#allocation3]   ;;  %s52_s2 = sshll.u32 %s569_s5, 4  ;;  %s53_s2 = int_to_ptr.hbm [resolvable:$true] %s52_s2 }
   0x7   :  { %s24_s12 = sshll.u32 %s485_s11, 4  ;;  %s486_s1 = smov [#allocation8]   ;;  %s25_s12 = int_to_ptr.vmem [resolvable:$true] %s24_s12 }
   0x8   :  { %30 = dma.hbm_to_vmem [thread:$0]  %s23_s8, 128, %s25_s12, [#allocation4], %s483_s9, %s483_s9, %s484_s10  }
   0x9   :  { %s54_s15 = sshll.u32 %s486_s1, 4  ;;  %s55_s15 = int_to_ptr.vmem [resolvable:$true] %s54_s15 }
   0xa   :  { %60 = dma.hbm_to_vmem [thread:$0]  %s53_s2, 1024, %s55_s15, [#allocation7], %s483_s9, %s483_s9, %s484_s10  }
   0xb   :  { %476 = dma.done.wait [#allocation4], 128  }
   0xc   :  { %477 = vsyncadd [#allocation4], 4294967168 }
   0xd   :  { %478 = dma.done.wait [#allocation7], 2048  }
   0xe   :  { %479 = vsyncadd [#allocation7], 4294965248  ;;  %v355_v0 = vld [vmem:[#allocation6 + $0x38] sm:$0xff]  ;;  %v354_v1 = vld [vmem:[#allocation6 + $0x30] sm:$0xff]  ;;  %v78_v18 = vstv %s564_s0  ;;  %s487_s21 = smov [#allocation9]   ;;  %s265_s24 = sshll.u32 %s571_s7, 4  ;;  %s266_s24 = int_to_ptr.hbm [resolvable:$true] %s265_s24 }
   0xf   :  { %156 = vmatpush.bf16.msra.mxu0 %v355_v0  ;;  %v363_v2 = vld [vmem:[#allocation8 + $0x38] sm:$0xff]  ;;  %v362_v3 = vld [vmem:[#allocation8 + $0x30] sm:$0xff]  ;;  %v353_v4 = vld [vmem:[#allocation6 + $0x28] sm:$0xff] }
  0x10   :  { %241 = vmatpush.bf16.msra.mxu1 %v363_v2  ;;  %v361_v5 = vld [vmem:[#allocation8 + $0x28] sm:$0xff]  ;;  %v352_v6 = vld [vmem:[#allocation6 + $0x20] sm:$0xff]  ;;  %v351_v7 = vld [vmem:[#allocation6 + $0x18] sm:$0xff] }
  0x11   :  { %v350_v8 = vld [vmem:[#allocation6 + $0x10] sm:$0xff]  ;;  %v349_v9 = vld [vmem:[#allocation6 + $0x8] sm:$0xff]  ;;  %v348_v10 = vld [vmem:[#allocation6] sm:$0xff] }
  0x12   :  { %v347_v11 = vld [vmem:[#allocation3] sm:$0xff]  ;;  %v360_v12 = vld [vmem:[#allocation8 + $0x20] sm:$0xff]  ;;  %v358_v14 = vld [vmem:[#allocation8 + $0x10] sm:$0xff] }
  0x13   :  { %157 = vmatpush.bf16.msra.mxu0 %v354_v1  ;;  %v359_v13 = vld [vmem:[#allocation8 + $0x18] sm:$0xff]  ;;  %v357_v15 = vld [vmem:[#allocation8 + $0x8] sm:$0xff]  ;;  %v356_v16 = vld [vmem:[#allocation8] sm:$0xff] }
  0x14   :  { %242 = vmatpush.bf16.msra.mxu1 %v362_v3  ;;  %v77_v17 = vld [vmem:[%s568_s4] sm:$0x1] }
  0x15   :  { %v79_v19 = vmul.f32 %v78_v18, %v77_v17  ;;  %v76_v20 = vld [vmem:[%s567_s3] sm:$0x1]  ;;  %s263_s3 = sshll.u32 %s487_s21, 4  ;;  %s264_s3 = int_to_ptr.vmem [resolvable:$true] %s263_s3 }
  0x16   :  { %v375_v31 = vld [vmem:[%s570_s6] ss:$0 sm:$0xff] }
  0x17   :  { %158 = vmatpush.bf16.msra.mxu0 %v353_v4  ;;  %v80_v21 = vadd.f32 %v79_v19, %v76_v20 }
  0x18   :  { %243 = vmatpush.bf16.msra.mxu1 %v361_v5 }
  0x19   :  { %v100_v23 = vperm.slane %v80_v21, 0 }
  0x1b   :  { %159 = vmatpush.bf16.msra.mxu0 %v352_v6 }
  0x1c   :  { %244 = vmatpush.bf16.msra.mxu1 %v360_v12 }
  0x1f   :  { %160 = vmatpush.bf16.msra.mxu0 %v351_v7 }
  0x20   :  { %245 = vmatpush.bf16.msra.mxu1 %v359_v13 }
  0x23   :  { %161 = vmatpush.bf16.msra.mxu0 %v350_v8 }
  0x24   :  { %246 = vmatpush.bf16.msra.mxu1 %v358_v14 }
  0x27   :  { %162 = vmatpush.bf16.msra.mxu0 %v349_v9 }
  0x28   :  { %247 = vmatpush.bf16.msra.mxu1 %v357_v15 }
  0x2b   :  { %163 = vmatpush.bf16.msra.mxu0 %v348_v10 }
  0x2c   :  { %248 = vmatpush.bf16.msra.mxu1 %v356_v16 }
  0x2e   :  { %164 = vmatmul.bf16.vlgmr.msra.gmra.mxu0 %v347_v11 }
  0xab   :  { %v165_v22 = vpop.f32.mrf.mxu0 }
  0xac   :  { %v166_v24 = vadd.f32 %v165_v22, %v100_v23 }
  0xae   :  { %376 = vtanh.f32 %v166_v24 }
  0xb3   :  { %v167_v25 = vpop.f32.mrf.mxu0 }
  0xb4   :  { %v168_v26 = vadd.f32 %v167_v25, %v100_v23  ;;  %v377_v27 = vpop.eup %376 }
  0xb6   :  { %378 = vtanh.f32 %v168_v26 }
  0xbc   :  { %v379_v28 = vpop.eup %378 }
  0xbd   :  { %v172_v29 = vpack.c.bf16 %v379_v28, %v377_v27 }
  0xbf   :  { %249 = vmatmul.bf16.vlgmr.msra.gmra.mxu1 %v172_v29 }
 0x13c   :  { %v250_v30 = vpop.f32.mrf.mxu1 }
 0x13d   :  { %v251_v33 = vadd.f32 %v375_v31, %v250_v30 }
 0x144   :  { %v252_v32 = vpop.f32.mrf.mxu1 }
 0x145   :  { %v253_v34 = vadd.f32 %v375_v31, %v252_v32 }
 0x147   :  { %v367_v35 = vpack.c.bf16 %v253_v34, %v251_v33 }
 0x149   :  { %368 = vst [vmem:[#allocation9] sm:$0xff] %v367_v35  }
 0x14a   :  { %271 = dma.vmem_to_hbm [thread:$0]  %s264_s3, 128, %s266_s24, [#allocation5], %s483_s9, %s483_s9, %s484_s10  }
 0x14b   :  { %480 = dma.done.wait [#allocation5], 128  }
 0x14c   :  { %481 = vsyncadd [#allocation5], 4294967168 }
 0x14d   :  { %276 = vsyncpa [#allocation4], 1 }
 0x14e   :  { %277 = vsyncpa [#allocation7], 1 }
 0x14f   :  { %278 = vsyncpa [#allocation5], 1 }

</bundles_post_ra>
